<compile_context>
chip_gen: v7x
topology: tpu7x:2x2x1
jax: 0.10.0
libtpu: 0.0.40
codegen_flags: <defaults>
</compile_context>

<pallas_src>
import jax
import jax.numpy as jnp
from jax.experimental import pallas as pl
from jax.experimental.pallas import tpu as pltpu


def _point_embed_kernel(x_ref, basis2_ref, phase_ref, w_sc_ref, w_xyz_ref,
                        b_ref, o_ref):
    x = x_ref[...]                                               # (tm, 3) f32
    # Frequency projection over the duplicated basis, plus the pi/2 phase so a
    # single sin() yields [sin(proj) | cos(proj)].
    proj = jnp.dot(x, basis2_ref[...], preferred_element_type=jnp.float32)
    proj = proj + phase_ref[...]                                 # (tm, F)
    sc = jnp.sin(proj)                                           # [sin | cos]
    # out = [sin | cos | xyz] @ W + b  ==  sc @ W[:F] + x @ W[F:] + b
    out = jnp.dot(sc, w_sc_ref[...], preferred_element_type=jnp.float32)
    out = out + jnp.dot(x, w_xyz_ref[...], preferred_element_type=jnp.float32)
    out = out + b_ref[...]
    o_ref[...] = out.astype(o_ref.dtype)


def make_basis(freq_embed_dim):
    """(3, freq_embed_dim // 2) block-diagonal frequency basis, same as PyTorch."""
    assert freq_embed_dim % 6 == 0
    k = freq_embed_dim // 6
    e = (2.0 ** jnp.arange(k, dtype=jnp.float32)) * jnp.float32(jnp.pi)
    z = jnp.zeros((k,), jnp.float32)
    return jnp.stack([
        jnp.concatenate([e, z, z]),
        jnp.concatenate([z, e, z]),
        jnp.concatenate([z, z, e]),
    ])                                                           # (3, F/2)


def point_embed(x, basis, w, b, *, tm=512):
    """x: (B, N, 3) f32.  basis: (3, F/2).  w: (F + 3, dim) = mlp.weight.T.
    b: (dim,).  Returns (B, N, dim)."""
    B, N, three = x.shape
    assert three == 3
    half = basis.shape[1]                      # F / 2
    F = 2 * half
    feat = F + 3                               # F + 3
    assert w.shape[0] == feat
    dim = w.shape[1]
    assert dim % 128 == 0, "embedding dim should be lane-dense (multiple of 128)"

    M = B * N
    # Clamp the token tile for tiny inputs so we don't pad 16 points to 512.
    tm = min(tm, pl.cdiv(M, 8) * 8)
    m_pad = pl.cdiv(M, tm) * tm                # ragged token count -> pad, slice back
    x2d = x.reshape(M, 3)
    if m_pad != M:
        x2d = jnp.pad(x2d, ((0, m_pad - M), (0, 0)))

    # Duplicate basis and add a pi/2 phase so sin(proj2 + phase) = [sin | cos].
    basis2 = jnp.concatenate([basis, basis], axis=1)             # (3, F)
    phase = jnp.concatenate([jnp.zeros((1, half), jnp.float32),
                             jnp.full((1, half), 0.5 * jnp.pi, jnp.float32)],
                            axis=1)                              # (1, F)
    # Split the MLP weight along its input axis: [sin|cos rows] and [xyz rows].
    w_sc = w[:F]                                                 # (F, dim)
    w_xyz = w[F:]                                                # (3, dim)
    b2d = b.reshape(1, dim)

    cost = pl.CostEstimate(
        flops=2 * m_pad * 3 * F + 2 * m_pad * F * dim + 2 * m_pad * 3 * dim,
        transcendentals=m_pad * F,             # one fused sin over F lanes
        bytes_accessed=4 * (x2d.size + basis2.size + phase.size
                            + w.size + b.size + m_pad * dim),
    )

    out2d = pl.pallas_call(
        _point_embed_kernel,
        out_shape=jax.ShapeDtypeStruct((m_pad, dim), x.dtype),
        grid_spec=pltpu.PrefetchScalarGridSpec(
            num_scalar_prefetch=0,
            grid=(m_pad // tm,),
            in_specs=[
                pl.BlockSpec((tm, 3), lambda i: (i, 0)),         # point tile
                pl.BlockSpec((3, F), lambda i: (0, 0)),          # basis2 (resident)
                pl.BlockSpec((1, F), lambda i: (0, 0)),          # phase  (resident)
                pl.BlockSpec((F, dim), lambda i: (0, 0)),        # W_sincos (resident)
                pl.BlockSpec((3, dim), lambda i: (0, 0)),        # W_xyz    (resident)
                pl.BlockSpec((1, dim), lambda i: (0, 0)),        # bias     (resident)
            ],
            out_specs=pl.BlockSpec((tm, dim), lambda i: (i, 0)),
        ),
        compiler_params=pltpu.CompilerParams(
            dimension_semantics=("parallel",),
        ),
        cost_estimate=cost,
    )(x2d, basis2, phase, w_sc, w_xyz, b2d)

    return out2d[:M].reshape(B, N, dim)


def _reference(x, basis, w, b):
    proj = jnp.einsum("bnd,de->bne", x, basis)
    emb = jnp.concatenate([jnp.sin(proj), jnp.cos(proj), x], axis=-1)
    return jnp.einsum("bnf,fd->bnd", emb, w) + b


if __name__ == "__main__":
    # Small shapes consistent with the module: freq_embed_dim=48, dim=512
    # (module defaults; dim is a lane-dense multiple of 128), a handful of points.
    batch, n_points = 2, 8
    dim, freq_embed_dim = 512, 48
    feat = freq_embed_dim + 3

    basis = make_basis(freq_embed_dim)

    key = jax.random.PRNGKey(0)
    kx, kw, kb = jax.random.split(key, 3)

    # Point coordinates in [-1, 1] (typical normalized point-cloud range).
    x = jax.random.uniform(kx, (batch, n_points, 3), jnp.float32, -1.0, 1.0)

    # nn.Linear(feat, dim) init: uniform(-1/sqrt(fan_in), +), stored transposed
    # as (in_features, out_features) so the hot path is feat @ W on the MXU.
    lim = 1.0 / jnp.sqrt(jnp.float32(feat))
    w = jax.random.uniform(kw, (feat, dim), jnp.float32, -lim, lim)
    b = jax.random.uniform(kb, (dim,), jnp.float32, -lim, lim)

    out = point_embed(x, basis, w, b)
    out = jax.block_until_ready(out)

    ref = _reference(x, basis, w, b)
    assert out.shape == (batch, n_points, dim)
    # sin(t + pi/2) vs cos(t) and differing transcendental paths can differ by
    # ~1e-4 for |t| up to 2^7*pi; 1e-3 still catches real bugs.
    assert jnp.allclose(out, ref, atol=1e-3, rtol=1e-3), "mismatch vs JAX reference"

    print("KERNEL_OK")
</pallas_src>

<mosaic_0001>
module attributes {stable_mosaic.version = 11 : i64} {
  func.func @_point_embed_kernel(%arg0: i32, %arg1: memref<16x3xf32, #tpu.memory_space<vmem>>, %arg2: memref<3x48xf32, #tpu.memory_space<vmem>>, %arg3: memref<1x48xf32, #tpu.memory_space<vmem>>, %arg4: memref<48x512xf32, #tpu.memory_space<vmem>>, %arg5: memref<3x512xf32, #tpu.memory_space<vmem>>, %arg6: memref<1x512xf32, #tpu.memory_space<vmem>>, %arg7: memref<16x512xf32, #tpu.memory_space<vmem>>) attributes {dimension_semantics = [#tpu.dimension_semantics<parallel>], iteration_bounds = array<i64: 1>, scalar_prefetch = 0 : i64, scratch_operands = 0 : i64, tpu.core_type = #tpu.core_type<tc>, window_params = [{transform_indices = @transform_0, window_bounds = array<i64: 16, 3>}, {pipeline_mode = #tpu.pipeline_mode<synchronous>, transform_indices = @transform_1, window_bounds = array<i64: 3, 48>}, {pipeline_mode = #tpu.pipeline_mode<synchronous>, transform_indices = @transform_2, window_bounds = array<i64: 1, 48>}, {pipeline_mode = #tpu.pipeline_mode<synchronous>, transform_indices = @transform_3, window_bounds = array<i64: 48, 512>}, {pipeline_mode = #tpu.pipeline_mode<synchronous>, transform_indices = @transform_4, window_bounds = array<i64: 3, 512>}, {pipeline_mode = #tpu.pipeline_mode<synchronous>, transform_indices = @transform_5, window_bounds = array<i64: 1, 512>}, {transform_indices = @transform_6, window_bounds = array<i64: 16, 512>}]} {
    %c0 = arith.constant 0 : index
    %c0_0 = arith.constant 0 : index
    %0 = vector.load %arg1[%c0, %c0_0] : memref<16x3xf32, #tpu.memory_space<vmem>>, vector<16x3xf32>
    %c0_1 = arith.constant 0 : index
    %c0_2 = arith.constant 0 : index
    %1 = vector.load %arg2[%c0_1, %c0_2] : memref<3x48xf32, #tpu.memory_space<vmem>>, vector<3x48xf32>
    %cst = arith.constant dense<0.000000e+00> : vector<16x48xf32>
    %2 = tpu.matmul %0, %1, %cst {dimension_numbers = #tpu.dot_dimension_numbers<[1], [0], [0], [1], [0, 0, 1, 1], [], []>} : vector<16x3xf32>, vector<3x48xf32>, vector<16x48xf32> -> vector<16x48xf32>
    %c0_3 = arith.constant 0 : index
    %c0_4 = arith.constant 0 : index
    %3 = vector.load %arg3[%c0_3, %c0_4] : memref<1x48xf32, #tpu.memory_space<vmem>>, vector<1x48xf32>
    %4 = vector.broadcast %3 : vector<1x48xf32> to vector<16x48xf32>
    %5 = arith.addf %2, %4 : vector<16x48xf32>
    %6 = math.sin %5 : vector<16x48xf32>
    %c0_5 = arith.constant 0 : index
    %c0_6 = arith.constant 0 : index
    %7 = vector.load %arg4[%c0_5, %c0_6] : memref<48x512xf32, #tpu.memory_space<vmem>>, vector<48x512xf32>
    %cst_7 = arith.constant dense<0.000000e+00> : vector<16x512xf32>
    %8 = tpu.matmul %6, %7, %cst_7 {dimension_numbers = #tpu.dot_dimension_numbers<[1], [0], [0], [1], [0, 0, 1, 1], [], []>} : vector<16x48xf32>, vector<48x512xf32>, vector<16x512xf32> -> vector<16x512xf32>
    %c0_8 = arith.constant 0 : index
    %c0_9 = arith.constant 0 : index
    %9 = vector.load %arg5[%c0_8, %c0_9] : memref<3x512xf32, #tpu.memory_space<vmem>>, vector<3x512xf32>
    %cst_10 = arith.constant dense<0.000000e+00> : vector<16x512xf32>
    %10 = tpu.matmul %0, %9, %cst_10 {dimension_numbers = #tpu.dot_dimension_numbers<[1], [0], [0], [1], [0, 0, 1, 1], [], []>} : vector<16x3xf32>, vector<3x512xf32>, vector<16x512xf32> -> vector<16x512xf32>
    %11 = arith.addf %8, %10 : vector<16x512xf32>
    %c0_11 = arith.constant 0 : index
    %c0_12 = arith.constant 0 : index
    %12 = vector.load %arg6[%c0_11, %c0_12] : memref<1x512xf32, #tpu.memory_space<vmem>>, vector<1x512xf32>
    %13 = vector.broadcast %12 : vector<1x512xf32> to vector<16x512xf32>
    %14 = arith.addf %11, %13 : vector<16x512xf32>
    %c0_13 = arith.constant 0 : index
    %c0_14 = arith.constant 0 : index
    %15 = vector.load %arg7[%c0_13, %c0_14] : memref<16x512xf32, #tpu.memory_space<vmem>>, vector<16x512xf32>
    tpu.vector_store %arg7[%c0_13, %c0_14], %14 {strides = array<i32>} : memref<16x512xf32, #tpu.memory_space<vmem>>, vector<16x512xf32>,
    return
  }
  func.func @transform_0(%arg0: i32) -> (i32, i32) {
    %c0_i32 = arith.constant 0 : i32
    %c0_i32_0 = arith.constant 0 : i32
    return %arg0, %c0_i32 : i32, i32
  }
  func.func @transform_1(%arg0: i32) -> (i32, i32) {
    %c0_i32 = arith.constant 0 : i32
    %c0_i32_0 = arith.constant 0 : i32
    %c0_i32_1 = arith.constant 0 : i32
    return %c0_i32, %c0_i32_0 : i32, i32
  }
  func.func @transform_2(%arg0: i32) -> (i32, i32) {
    %c0_i32 = arith.constant 0 : i32
    %c0_i32_0 = arith.constant 0 : i32
    %c0_i32_1 = arith.constant 0 : i32
    return %c0_i32, %c0_i32_0 : i32, i32
  }
  func.func @transform_3(%arg0: i32) -> (i32, i32) {
    %c0_i32 = arith.constant 0 : i32
    %c0_i32_0 = arith.constant 0 : i32
    %c0_i32_1 = arith.constant 0 : i32
    return %c0_i32, %c0_i32_0 : i32, i32
  }
  func.func @transform_4(%arg0: i32) -> (i32, i32) {
    %c0_i32 = arith.constant 0 : i32
    %c0_i32_0 = arith.constant 0 : i32
    %c0_i32_1 = arith.constant 0 : i32
    return %c0_i32, %c0_i32_0 : i32, i32
  }
  func.func @transform_5(%arg0: i32) -> (i32, i32) {
    %c0_i32 = arith.constant 0 : i32
    %c0_i32_0 = arith.constant 0 : i32
    %c0_i32_1 = arith.constant 0 : i32
    return %c0_i32, %c0_i32_0 : i32, i32
  }
  func.func @transform_6(%arg0: i32) -> (i32, i32) {
    %c0_i32 = arith.constant 0 : i32
    %c0_i32_0 = arith.constant 0 : i32
    return %arg0, %c0_i32 : i32, i32
  }
}

</mosaic_0001>

<bundles_post_ra>
// kernel: tpu_custom_call.1
= control target key start
LH: loop header
LB: loop body
LE: loop exit
PB: predicated region body
PF: predicated region fallthrough
CT: control target
= control target key end

     0   :  { %11 = vsyncpa [#allocation3], 0  ;;  %s1070_s0 = inlined_call_operand.vmem [shape: f32[16,3], index: 0, kind: input, shape index: {}]   ;;  %s1071_s1 = inlined_call_operand.vmem [shape: f32[3,48], index: 1, kind: input, shape index: {}]   ;;  %s1072_s2 = inlined_call_operand.vmem [shape: f32[1,48], index: 2, kind: input, shape index: {}]   ;;  %s1073_s3 = inlined_call_operand.hbm [shape: f32[48,512], index: 3, kind: input, shape index: {}]   ;;  %s1074_s4 = inlined_call_operand.vmem [shape: f32[3,512], index: 4, kind: input, shape index: {}]   ;;  %s1075_s5 = inlined_call_operand.vmem [shape: f32[1,512], index: 5, kind: input, shape index: {}]   ;;  %s1076_s6 = inlined_call_operand.hbm [shape: f32[16,512], index: 6, kind: output, shape index: {}]  }
   0x1   :  { %12 = vsyncpa [#allocation4], 0  ;;  %s891_s21 = smov [#allocation2]   ;;  %s843_s25 = scalar_lea.hbm %s1073_s3, 3072 }
   0x2   :  { %s24_s22 = sshll.u32 %s891_s21, 4  ;;  %p844_p0 = scmp.ne.s32.totalorder %s1073_s3, %s843_s25  ;;  %s25_s22 = int_to_ptr.vmem [resolvable:$true] %s24_s22 }
   0x3   :  { %p847_p1 = scmp.lt.u32.totalorder %s843_s25, %s1073_s3 }
   0x5   :  { %p849_p2 = pnand %p847_p1, %p844_p0 }
   0x7   :  { %852 = shalt.err (!%p849_p2)
}
   0x8   :  { %s853_s30 = scalar_lea.vmem %s25_s22, 3072  ;;  %p858_p4 = scmp.lt.s32.totalorder %s25_s22, %s25_s22 }
   0x9   :  { %p854_p3 = scmp.ne.s32.totalorder %s25_s22, %s853_s30  ;;  %p859_p5 = scmp.lt.s32.totalorder %s853_s30, %s853_s30 }
   0xb   :  { %p860_p6 = por %p859_p5, %p858_p4 }
   0xd   :  { %p861_p7 = pnand %p860_p6, %p854_p3 }
   0xf   :  { %864 = shalt.err (!%p861_p7)
}
  0x10   :  { %s892_s7 = smov 512   ;;  %s893_s8 = smov 32  }
  0x11   :  { %30 = dma.hbm_to_vmem [thread:$0]  %s1073_s3, 3072, %s25_s22, [#allocation3], %s892_s7, %s892_s7, %s893_s8  }
  0x12   :  { %887 = dma.done.wait [#allocation3], 3072  }
  0x13   :  { %888 = vsyncadd [#allocation3], 4294964224  ;;  %vm55_vm0 = vcmask 1042432   ;;  %vm48_vm1 = vcmask 23552   ;;  %v40_v0 = vld [vmem:[%s1071_s1] sm:$0x7] }
  0x14   :  { %v38_v1 = vld [vmem:[%s1070_s0] sm:$0xff]  ;;  %v39_v2 = vld [vmem:[%s1070_s0 + $0x8] sm:$0xff]  ;;  %777 = vmatprep.subr.msk.mxu0 %vm55_vm0, %v40_v0  ;;  %v343_v5 = vld [vmem:[#allocation2 + $0x8] sm:$0xff]  ;;  %v894_v8 = vmov 0.0   ;;  %s901_s20 = smov [#allocation5]  }
  0x15   :  { %779 = vmatprep.mubr.msk.f32.mxu0 %vm48_vm1, %v38_v1  ;;  %778 = vmatpush3.msk.msra.mxu0 %vm55_vm0, %v40_v0  ;;  %v367_v3 = vld [vmem:[%s1074_s4 + $0x8] sm:$0x77]  ;;  %v366_v4 = vld [vmem:[%s1074_s4] sm:$0x77]  ;;  %v347_v9 = vld [vmem:[#allocation2 + $0x28] sm:$0xff]  ;;  %s738_s21 = sshll.u32 %s901_s20, 4  ;;  %s739_s21 = int_to_ptr.vmem [resolvable:$true] %s738_s21 }
  0x16   :  { %780 = vmatmul.mubr.msk.f32.vlgmr.msra.gmra.mrb[0].mxu0 %vm48_vm1, %v39_v2  ;;  %v371_v6 = vcombine.high %v367_v3, %v367_v3  ;;  %v370_v7 = vcombine.high %v366_v4, %v366_v4  ;;  %444 = vmatprep.mubr.f32.mxu1 %v894_v8  ;;  %v345_v10 = vld [vmem:[#allocation2 + $0x18] sm:$0xff]  ;;  %v782_v12 = vpack.c.bf16 %v347_v9, %v343_v5  ;;  %v342_v14 = vld [vmem:[#allocation2] sm:$0xff]  ;;  %v344_v16 = vld [vmem:[#allocation2 + $0x10] sm:$0xff]  ;;  %v895_v5 = vmov 683565275   ;;  %p870_p9 = scmp.lt.s32.totalorder %s739_s21, %s739_s21 }
  0x17   :  { %521 = vmatprep.mubr.f32.mxu0 %v894_v8  ;;  %v349_v11 = vld [vmem:[#allocation2 + $0x38] sm:$0xff]  ;;  %v346_v15 = vld [vmem:[#allocation2 + $0x20] sm:$0xff]  ;;  %v348_v18 = vld [vmem:[#allocation2 + $0x30] sm:$0xff] }
  0x18   :  { %v794_v13 = vpack.c.bf16 %v349_v11, %v345_v10  ;;  %766 = vmatprep.subr.msk.mxu0 %vm55_vm0, %v371_v6  ;;  %762 = vmatprep.subr.msk.mxu1 %vm55_vm0, %v370_v7  ;;  %v784_v17 = vpack.c.bf16 %v346_v15, %v342_v14  ;;  %v351_v19 = vld [vmem:[#allocation2 + $0x48] sm:$0xff]  ;;  %v796_v21 = vpack.c.bf16 %v348_v18, %v344_v16  ;;  %v353_v23 = vld [vmem:[#allocation2 + $0x58] sm:$0xff]  ;;  %v350_v25 = vld [vmem:[#allocation2 + $0x40] sm:$0xff]  ;;  %v896_v10 = vmov 2475754826  }
  0x19   :  { %v355_v20 = vld [vmem:[#allocation2 + $0x68] sm:$0xff]  ;;  %767 = vmatpush1.msk.msra.mxu0 %vm55_vm0, %v367_v3  ;;  %763 = vmatpush1.msk.msra.mxu1 %vm55_vm0, %v366_v4  ;;  %v357_v24 = vld [vmem:[#allocation2 + $0x78] sm:$0xff]  ;;  %v354_v27 = vld [vmem:[#allocation2 + $0x60] sm:$0xff]  ;;  %v898_v14 = vmov 2102212464  }
  0x1a   :  { %v786_v22 = vpack.c.bf16 %v355_v20, %v351_v19  ;;  %783 = vmatprep.subr.bf16.mxu1 %v782_v12  ;;  %795 = vmatprep.subr.bf16.mxu0 %v794_v13  ;;  %v798_v26 = vpack.c.bf16 %v357_v24, %v353_v23  ;;  %v352_v28 = vld [vmem:[#allocation2 + $0x50] sm:$0xff]  ;;  %v359_v30 = vld [vmem:[#allocation2 + $0x88] sm:$0xff]  ;;  %v361_v32 = vld [vmem:[#allocation2 + $0x98] sm:$0xff]  ;;  %v788_v33 = vpack.c.bf16 %v354_v27, %v350_v25  ;;  %v897_v12 = vmov 2131351028  }
  0x1b   :  { %v356_v29 = vld [vmem:[#allocation2 + $0x70] sm:$0xff]  ;;  %764 = vmatmul.mubr.msk.f32.vlgmr.msra.gmra.mrb[0].mxu1 %vm48_vm1, %v38_v1  ;;  %768 = vmatmul.mubr.msk.f32.vlgmr.msra.gmra.mrb[2].mxu0 %vm48_vm1, %v38_v1  ;;  %v363_v31 = vld [vmem:[#allocation2 + $0xa8] sm:$0xff]  ;;  %v365_v35 = vld [vmem:[#allocation2 + $0xb8] sm:$0xff]  ;;  %v899_v16 = vmov 920167782  }
  0x1c   :  { %785 = vmatpush1.bf16.msra.mxu1 %v784_v17  ;;  %797 = vmatpush1.bf16.msra.mxu0 %v796_v21  ;;  %v800_v34 = vpack.c.bf16 %v356_v29, %v352_v28  ;;  %v358_v36 = vld [vmem:[#allocation2 + $0x80] sm:$0xff]  ;;  %v790_v37 = vpack.c.bf16 %v363_v31, %v359_v30  ;;  %v802_v38 = vpack.c.bf16 %v365_v35, %v361_v32  ;;  %v360_v40 = vld [vmem:[#allocation2 + $0x90] sm:$0xff]  ;;  %v900_v23 = vmov 1326507024  }
  0x1d   :  { %787 = vmatprep.subr.bf16.mxu1 %v786_v22  ;;  %799 = vmatprep.subr.bf16.mxu0 %v798_v26  ;;  %v362_v39 = vld [vmem:[#allocation2 + $0xa0] sm:$0xff]  ;;  %v364_v41 = vld [vmem:[#allocation2 + $0xb0] sm:$0xff] }
  0x1e   :  { %450 = vmatprep.mubr.f32.mxu1 %v894_v8  ;;  %527 = vmatprep.mubr.f32.mxu0 %v894_v8  ;;  %v792_v42 = vpack.c.bf16 %v362_v39, %v358_v36  ;;  %v804_v43 = vpack.c.bf16 %v364_v41, %v360_v40  ;;  %v750_v44 = vld [vmem:[%s1072_s2] ss:$0 sm:$0xff] }
  0x1f   :  { %765 = vmatmul.mubr.msk.f32.gmra.mrb[2].mxu1 %vm48_vm1, %v39_v2  ;;  %769 = vmatmul.mubr.msk.f32.gmra.mrb[4].mxu0 %vm48_vm1, %v39_v2 }
  0x20   :  { %789 = vmatpush1.bf16.msra.mxu1 %v788_v33  ;;  %801 = vmatpush1.bf16.msra.mxu0 %v800_v34 }
  0x21   :  { %791 = vmatprep.subr.bf16.mxu1 %v790_v37  ;;  %803 = vmatprep.subr.bf16.mxu0 %v802_v38 }
  0x22   :  { %605 = vmatprep.mubr.f32.mxu1 %v894_v8  ;;  %682 = vmatprep.mubr.f32.mxu0 %v894_v8 }
  0x24   :  { %793 = vmatpush1.bf16.msra.mxu1 %v792_v42  ;;  %805 = vmatpush1.bf16.msra.mxu0 %v804_v43 }
  0xe9   :  { %v781_v45 = vpop.f32.mrb[0].mxu0 }
  0xea   :  { %v988_v46 = vadd.f32 %v781_v45, %v750_v44  ;;  %v125_v47 = vpop.f32.mrb[1].mxu0 }
  0xeb   :  { %v990_v48 = vadd.f32 %v750_v44, %v125_v47 }
  0xec   :  { %v238_v49 = vand.u32 2147483647, %v988_v46  ;;  %v241_v50 = vand.u32 2139095040, %v988_v46  ;;  %vm240_vm0 = vcmp.lt.s32.totalorder %v988_v46, 0 }
  0xed   :  { %v137_v51 = vand.u32 2139095040, %v990_v48  ;;  %v134_v54 = vand.u32 2147483647, %v990_v48 }
  0xee   :  { %v242_v52 = vshrl.u32 %v241_v50, 23  ;;  %v245_v53 = vand.u32 8388607, %v238_v49  ;;  %vm239_vm1 = vcmp.le.f32.partialorder %v238_v49, 0.7853982 }
  0xef   :  { %v138_v55 = vshrl.u32 %v137_v51, 23  ;;  %v1000_v60 = vand.u32 8388607, %v134_v54 }
  0xf0   :  { %v758_v56 = vadd.s32 4294967169, %v242_v52  ;;  %v246_v59 = vor.u32 8388608, %v245_v53 }
  0xf1   :  { %v754_v57 = vadd.s32 4294967169, %v138_v55  ;;  %v142_v3 = vor.u32 8388608, %v1000_v60 }
  0xf2   :  { %v248_v58 = vadd.s32 1, %v758_v56  ;;  %v1002_v2 = vshll.u32 %v246_v59, 8 }
  0xf3   :  { %v144_v61 = vadd.s32 1, %v754_v57 }
  0xf4   :  { %vm249_vm2 = vcmp.gt.s32.totalorder %v248_v58, 0 }
  0xf5   :  { %v250_v62 = vsel %vm249_vm2, %v248_v58, 0  ;;  %vm145_vm3 = vcmp.gt.s32.totalorder %v144_v61, 0  ;;  %vm136_vm2 = vcmp.lt.s32.totalorder %v990_v48, 0 }
  0xf6   :  { %v251_v63 = vshrl.u32 %v250_v62, 5  ;;  %v252_v0 = vand.u32 31, %v250_v62  ;;  %v146_v1 = vsel %vm145_vm3, %v144_v61, 0  ;;  %v182_v62 = vshll.u32 %v142_v3, 8 }
  0xf7   :  { %v1005_v7 = vshrl.u32 %v146_v1, 5  ;;  %v148_v9 = vand.u32 31, %v146_v1  ;;  %vm135_vm3 = vcmp.le.f32.partialorder %v134_v54, 0.7853982 }
  0xf8   :  { %v253_v4 = vsub.s32 32, %v252_v0  ;;  %v255_v6 = vshll.u32 %v895_v5, %v252_v0  ;;  %v258_v11 = vshll.u32 %v896_v10, %v252_v0  ;;  %v261_v13 = vshll.u32 %v897_v12, %v252_v0 }
  0xf9   :  { %v264_v15 = vshll.u32 %v898_v14, %v252_v0  ;;  %v267_v17 = vshll.u32 %v899_v16, %v252_v0  ;;  %vm270_vm4 = vcmp.lt.s32.totalorder %v251_v63, 1  ;;  %vm271_vm5 = vcmp.lt.s32.totalorder %v251_v63, 2 }
  0xfa   :  { %v256_v18 = vshrl.u32 %v896_v10, %v253_v4  ;;  %v259_v19 = vshrl.u32 %v897_v12, %v253_v4  ;;  %v262_v20 = vshrl.u32 %v898_v14, %v253_v4  ;;  %v254_v21 = vshrl.u32 %v895_v5, %v253_v4 }
  0xfb   :  { %v265_v22 = vshrl.u32 %v899_v16, %v253_v4  ;;  %v268_v24 = vshrl.u32 %v900_v23, %v253_v4  ;;  %v149_v28 = vsub.s32 32, %v148_v9  ;;  %vm272_vm6 = vcmp.lt.s32.totalorder %v251_v63, 3 }
  0xfc   :  { %v257_v25 = vor.u32 %v256_v18, %v255_v6  ;;  %v260_v26 = vor.u32 %v259_v19, %v258_v11  ;;  %v263_v27 = vor.u32 %v262_v20, %v261_v13  ;;  %vm273_vm7 = vcmp.lt.s32.totalorder %v251_v63, 4 }
  0xfd   :  { %v266_v29 = vor.u32 %v265_v22, %v264_v15  ;;  %v269_v30 = vor.u32 %v268_v24, %v267_v17  ;;  %v151_v38 = vshll.u32 %v895_v5, %v148_v9  ;;  %v152_v41 = vshrl.u32 %v896_v10, %v149_v28 }
  0xfe   :  { %v274_v31 = vsel %vm270_vm4, %v254_v21, %v257_v25  ;;  %v275_v32 = vsel %vm273_vm7, %v263_v27, 2102212464  ;;  %v278_v33 = vsel %vm270_vm4, %v257_v25, %v260_v26  ;;  %v282_v34 = vsel %vm270_vm4, %v260_v26, %v263_v27 }
  0xff   :  { %v276_v35 = vsel %vm272_vm6, %v260_v26, %v275_v32  ;;  %v279_v36 = vsel %vm273_vm7, %v266_v29, 920167782  ;;  %v283_v37 = vsel %vm273_vm7, %v269_v30, 1326507024  ;;  %v154_v42 = vshll.u32 %v896_v10, %v148_v9 }
 0x100   :  { %v280_v39 = vsel %vm272_vm6, %v263_v27, %v279_v36  ;;  %v284_v40 = vsel %vm272_vm6, %v266_v29, %v283_v37  ;;  %v277_v43 = vsel %vm271_vm5, %v274_v31, %v276_v35  ;;  %v155_v47 = vshrl.u32 %v897_v12, %v149_v28 }
 0x101   :  { %v281_v44 = vsel %vm271_vm5, %v278_v33, %v280_v39  ;;  %v285_v45 = vsel %vm271_vm5, %v282_v34, %v284_v40  ;;  %v153_v55 = vor.u32 %v152_v41, %v151_v38  ;;  %v157_v57 = vshll.u32 %v897_v12, %v148_v9 }
 0x102   :  { %v1014_v50 = vmul.u32.u64.low %v1002_v2, %v285_v45  ;;  %v1015_v51 = vmul.u32.u64.high %v1002_v2, %v285_v45, %v1014_v50  ;;  %v1018_v52 = vmul.u32.u64.low %v1002_v2, %v281_v44  ;;  %v1019_v53 = vmul.u32.u64.high %v1002_v2, %v281_v44, %v1018_v52 }
 0x103   :  { %v156_v56 = vor.u32 %v155_v47, %v154_v42  ;;  %v158_v58 = vshrl.u32 %v898_v14, %v149_v28  ;;  %v160_v59 = vshll.u32 %v898_v14, %v148_v9  ;;  %v161_v60 = vshrl.u32 %v899_v16, %v149_v28 }
 0x104   :  { %v164_v61 = vshrl.u32 %v900_v23, %v149_v28  ;;  %v293_v63 = vmul.u32 %v1002_v2, %v277_v43  ;;  %v150_v0 = vshrl.u32 %v895_v5, %v149_v28  ;;  %v163_v4 = vshll.u32 %v899_v16, %v148_v9 }
 0x105   :  { %v159_v1 = vor.u32 %v158_v58, %v157_v57  ;;  %vm295_vm8 = vc.u32 %v1015_v51, %v1018_v52  ;;  %v296_v6 = vadd.s32 1, %v1019_v53  ;;  %v162_v10 = vor.u32 %v161_v60, %v160_v59 }
 0x106   :  { %vm166_vm9 = vcmp.lt.s32.totalorder %v1005_v7, 1  ;;  %v165_v11 = vor.u32 %v164_v61, %v163_v4  ;;  %vm168_vm10 = vcmp.lt.s32.totalorder %v1005_v7, 3  ;;  %vm169_vm11 = vcmp.lt.s32.totalorder %v1005_v7, 4 }
 0x107   :  { %v174_v12 = vsel %vm166_vm9, %v153_v55, %v156_v56  ;;  %v297_v3 = vsel %vm295_vm8, %v296_v6, %v1019_v53  ;;  %v171_v13 = vsel %vm169_vm11, %v159_v1, 2102212464  ;;  %v175_v2 = vsel %vm169_vm11, %v162_v10, 920167782 }
 0x108   :  { %v178_v5 = vsel %vm166_vm9, %v156_v56, %v159_v1  ;;  %v298_v14 = vadd.s32 %v297_v3, %v293_v63  ;;  %vm167_vm12 = vcmp.lt.s32.totalorder %v1005_v7, 2  ;;  %v176_v9 = vsel %vm168_vm10, %v159_v1, %v175_v2 }
 0x109   :  { %v179_v15 = vsel %vm169_vm11, %v165_v11, 1326507024  ;;  %v170_v16 = vsel %vm166_vm9, %v150_v0, %v153_v55  ;;  %v172_v17 = vsel %vm168_vm10, %v156_v56, %v171_v13  ;;  %v177_v18 = vsel %vm167_vm12, %v174_v12, %v176_v9 }
 0x10a   :  { %v180_v19 = vsel %vm168_vm10, %v162_v10, %v179_v15  ;;  %v299_v20 = vadd.s32 536870912, %v298_v14  ;;  %v1029_v22 = vmul.u32.u64.low %v182_v62, %v177_v18  ;;  %v1030_v23 = vmul.u32.u64.high %v182_v62, %v177_v18, %v1029_v22 }
 0x10b   :  { %v181_v21 = vsel %vm167_vm12, %v178_v5, %v180_v19  ;;  %v173_v27 = vsel %vm167_vm12, %v170_v16, %v172_v17  ;;  %v294_v43 = vadd.s32 %v1018_v52, %v1015_v51  ;;  %vm330_vm7 = vweird.f32 %v988_v46 }
 0x10c   :  { %v1032_v24 = vmul.u32.u64.low %v182_v62, %v181_v21  ;;  %v1033_v25 = vmul.u32.u64.high %v182_v62, %v181_v21, %v1032_v24  ;;  %v300_v26 = vshrl.u32 %v299_v20, 30  ;;  %v192_v29 = vadd.s32 1, %v1030_v23 }
 0x10d   :  { %v189_v7 = vmul.u32 %v182_v62, %v173_v27  ;;  %vm534_vm11 = vcmask 392192   ;;  %vm226_vm12 = vweird.f32 %v990_v48 }
 0x10e   :  { %v301_v28 = vshll.u32 %v300_v26, 30  ;;  %vm191_vm13 = vc.u32 %v1033_v25, %v1029_v22  ;;  %v190_v0 = vadd.s32 %v1029_v22, %v1033_v25  ;;  %v324_v52 = vsub.s32 4, %v300_v26 }
 0x10f   :  { %v193_v31 = vsel %vm191_vm13, %v192_v29, %v1030_v23 }
 0x110   :  { %v302_v30 = vsub.s32 %v298_v14, %v301_v28  ;;  %v194_v32 = vadd.s32 %v193_v31, %v189_v7  ;;  %v325_v5 = vsel %vm240_vm0, %v324_v52, %v300_v26 }
 0x111   :  { %v327_v17 = vsel %vm239_vm1, 0, %v325_v5 }
 0x112   :  { %v304_v33 = vsub.s32 0, %v302_v30  ;;  %v195_v34 = vadd.s32 536870912, %v194_v32  ;;  %v331_v20 = vadd.s32 3, %v327_v17 }
 0x114   :  { %v759_v35 = vmin.u32 %v304_v33, %v302_v30  ;;  %v196_v36 = vshrl.u32 %v195_v34, 30  ;;  %v332_v24 = vand.u32 3, %v331_v20 }
 0x116   :  { %v306_v37 = vclz %v759_v35  ;;  %v197_v38 = vshll.u32 %v196_v36, 30  ;;  %v220_v19 = vsub.s32 4, %v196_v36  ;;  %vm337_vm4 = vcmp.eq.s32.totalorder %v332_v24, 2 }
 0x117   :  { %vm334_vm5 = vcmp.eq.s32.totalorder %v332_v24, 0  ;;  %vm333_vm6 = vcmp.lt.s32.totalorder %v332_v24, 2 }
 0x118   :  { %v760_v39 = vadd.s32 4294967294, %v306_v37  ;;  %v198_v40 = vsub.s32 %v194_v32, %v197_v38  ;;  %v221_v22 = vsel %vm136_vm2, %v220_v19, %v196_v36 }
 0x119   :  { %v223_v26 = vsel %vm135_vm3, 0, %v221_v22 }
 0x11a   :  { %vm761_vm14 = vcmp.lt.s32.totalorder %v760_v39, 0  ;;  %v200_v42 = vsub.s32 0, %v198_v40  ;;  %v227_v7 = vadd.s32 3, %v223_v26 }
 0x11b   :  { %v309_v41 = vsel %vm761_vm14, 0, %v760_v39 }
 0x11c   :  { %v310_v44 = vsub.s32 32, %v309_v41  ;;  %v314_v45 = vsub.s32 4294967266, %v309_v41  ;;  %v755_v47 = vmin.u32 %v200_v42, %v198_v40  ;;  %v311_v50 = vshll.u32 %v302_v30, %v309_v41 }
 0x11d   :  { %v228_v33 = vand.u32 3, %v227_v7 }
 0x11e   :  { %v312_v53 = vshrl.u32 %v294_v43, %v310_v44  ;;  %v315_v55 = vadd.s32 127, %v314_v45  ;;  %v202_v56 = vclz %v755_v47  ;;  %v695_v45 = vld [vmem:[%s1075_s5] sm:$0xf]  ;;  %s865_s5 = scalar_lea.vmem %s739_s21, 1024 }
 0x11f   :  { %vm233_vm8 = vcmp.eq.s32.totalorder %v228_v33, 2  ;;  %vm230_vm9 = vcmp.eq.s32.totalorder %v228_v33, 0  ;;  %vm229_vm10 = vcmp.lt.s32.totalorder %v228_v33, 2  ;;  %p866_p8 = scmp.ne.s32.totalorder %s739_s21, %s865_s5  ;;  %p871_p10 = scmp.lt.s32.totalorder %s865_s5, %s865_s5 }
 0x120   :  { %v313_v57 = vor.u32 %v312_v53, %v311_v50  ;;  %v316_v58 = vshll.u32 %v315_v55, 23  ;;  %v756_v59 = vadd.s32 4294967294, %v202_v56 }
 0x121   :  { %p872_p11 = por %p871_p10, %p870_p9 }
 0x122   :  { %v317_v60 = vor.u32 4788187, %v316_v58  ;;  %vm757_vm15 = vcmp.lt.s32.totalorder %v756_v59, 0  ;;  %v320_v62 = vcvt.s32.f32 %v313_v57 }
 0x123   :  { %v205_v63 = vsel %vm757_vm15, 0, %v756_v59  ;;  %p873_p12 = pnand %p872_p11, %p866_p8 }
 0x124   :  { %v318_v61 = vand.u32 2147483647, %v317_v60  ;;  %v206_v1 = vsub.s32 32, %v205_v63  ;;  %v210_v4 = vsub.s32 4294967266, %v205_v63  ;;  %v207_v6 = vshll.u32 %v198_v40, %v205_v63 }
 0x126   :  { %v321_v51 = vmul.f32 %v320_v62, %v318_v61  ;;  %v208_v10 = vshrl.u32 %v190_v0, %v206_v1  ;;  %v211_v11 = vadd.s32 127, %v210_v4 }
 0x128   :  { %v322_v12 = vxor.u32 2147483648, %v321_v51  ;;  %v209_v3 = vor.u32 %v208_v10, %v207_v6  ;;  %v212_v13 = vshll.u32 %v211_v11, 23 }
 0x12a   :  { %v323_v2 = vsel %vm240_vm0, %v322_v12, %v321_v51  ;;  %v213_v9 = vor.u32 4788187, %v212_v13  ;;  %v216_v16 = vcvt.s32.f32 %v209_v3 }
 0x12b   :  { %v326_v14 = vsel %vm239_vm1, %v988_v46, %v323_v2  ;;  %v697_v46 = vlaneseq }
 0x12c   :  { %835 = vcosq.f32 %v326_v14  ;;  %v214_v15 = vand.u32 2147483647, %v213_v9 }
 0x12d   :  { %837 = vsinq.f32 %v326_v14  ;;  %v698_v42 = vshrl.u32 %v697_v46, 7 }
 0x12e   :  { %v217_v18 = vmul.f32 %v216_v16, %v214_v15 }
 0x12f   :  { %v699_v43 = vsub.s32 0, %v698_v42  ;;  %v707_v44 = vsub.s32 2, %v698_v42  ;;  %v703_v47 = vsub.s32 1, %v698_v42 }
 0x130   :  { %v218_v21 = vxor.u32 2147483648, %v217_v18 }
 0x131   :  { %v700_v50 = vrot.slane %v695_v45, %v699_v43  ;;  %v708_v53 = vrot.slane %v695_v45, %v707_v44  ;;  %v704_v55 = vrot.slane %v695_v45, %v703_v47 }
 0x132   :  { %v219_v49 = vsel %vm136_vm2, %v218_v21, %v217_v18 }
 0x133   :  { %v222_v23 = vsel %vm135_vm3, %v990_v48, %v219_v49  ;;  %v711_v48 = vsub.s32 3, %v698_v42 }
 0x134   :  { %839 = vcosq.f32 %v222_v23 }
 0x135   :  { %841 = vsinq.f32 %v222_v23  ;;  %v712_v56 = vrot.slane %v695_v45, %v711_v48 }
 0x136   :  { %v836_v25 = vpop.eup %835 }
 0x137   :  { %v838_v27 = vpop.eup %837  ;;  %v338_v28 = vxor.u32 2147483648, %v836_v25 }
 0x138   :  { %v335_v29 = vxor.u32 2147483648, %v838_v27 }
 0x139   :  { %v339_v30 = vsel %vm337_vm4, %v338_v28, %v838_v27 }
 0x13a   :  { %v336_v31 = vsel %vm334_vm5, %v836_v25, %v335_v29 }
 0x13b   :  { %v340_v54 = vsel %vm333_vm6, %v336_v31, %v339_v30 }
 0x13c   :  { %v341_v32 = vsel %vm330_vm7, nan, %v340_v54 }
 0x13e   :  { %v840_v34 = vpop.eup %839 }
 0x13f   :  { %v842_v35 = vpop.eup %841  ;;  %v234_v36 = vxor.u32 2147483648, %v840_v34 }
 0x140   :  { %v231_v37 = vxor.u32 2147483648, %v842_v35 }
 0x141   :  { %v235_v38 = vsel %vm233_vm8, %v234_v36, %v842_v35 }
 0x142   :  { %v232_v39 = vsel %vm230_vm9, %v840_v34, %v231_v37 }
 0x143   :  { %v236_v40 = vsel %vm229_vm10, %v232_v39, %v235_v38 }
 0x144   :  { %v237_v41 = vsel %vm226_vm12, nan, %v236_v40 }
 0x145   :  { %770 = vmatmul.mubr.msk.f32.vlgmr.msra.gmra.mrb[0].mxu1 %vm534_vm11, %v237_v41  ;;  %772 = vmatmul.mubr.msk.f32.vlgmr.msra.gmra.mrb[2].mxu0 %vm534_vm11, %v237_v41 }
 0x146   :  { %611 = vmatprep.mubr.f32.mxu1 %v894_v8  ;;  %688 = vmatprep.mubr.f32.mxu0 %v894_v8 }
 0x149   :  { %771 = vmatmul.mubr.msk.f32.gmra.mrb[2].mxu1 %vm534_vm11, %v341_v32  ;;  %773 = vmatmul.mubr.msk.f32.gmra.mrb[4].mxu0 %vm534_vm11, %v341_v32 }
 0x218   :  { %v607_v57 = vpop.f32.mrb[0].mxu1  ;;  %v684_v58 = vpop.f32.mrb[2].mxu0 }
 0x219   :  { %v717_v59 = vadd.f32 %v700_v50, %v607_v57  ;;  %v719_v8 = vadd.f32 %v708_v53, %v684_v58  ;;  %v609_v60 = vpop.f32.mrb[1].mxu1  ;;  %v686_v61 = vpop.f32.mrb[3].mxu0 }
 0x21a   :  { %v718_v62 = vadd.f32 %v704_v55, %v609_v60  ;;  %v720_v63 = vadd.f32 %v712_v56, %v686_v61 }
 0x21b   :  { %725 = vst [vmem:[#allocation5] sm:$0xff] %v717_v59  ;;  %727 = vst [vmem:[#allocation5 + $0x10] sm:$0xff] %v719_v8 }
 0x21c   :  { %726 = vst [vmem:[#allocation5 + $0x8] sm:$0xff] %v718_v62  ;;  %728 = vst [vmem:[#allocation5 + $0x18] sm:$0xff] %v720_v63  ;;  %v613_v0 = vpop.f32.mrb[2].mxu1  ;;  %v690_v1 = vpop.f32.mrb[4].mxu0 }
 0x21d   :  { %v721_v4 = vadd.f32 %v700_v50, %v613_v0  ;;  %v723_v51 = vadd.f32 %v708_v53, %v690_v1  ;;  %v615_v52 = vpop.f32.mrb[3].mxu1  ;;  %v692_v6 = vpop.f32.mrb[5].mxu0 }
 0x21e   :  { %v722_v10 = vadd.f32 %v704_v55, %v615_v52  ;;  %v724_v11 = vadd.f32 %v712_v56, %v692_v6 }
 0x21f   :  { %729 = vst [vmem:[#allocation5 + $0x20] sm:$0xff] %v721_v4  ;;  %731 = vst [vmem:[#allocation5 + $0x30] sm:$0xff] %v723_v51 }
 0x220   :  { %730 = vst [vmem:[#allocation5 + $0x28] sm:$0xff] %v722_v10  ;;  %732 = vst [vmem:[#allocation5 + $0x38] sm:$0xff] %v724_v11 }
 0x221   :  { %876 = shalt.err (!%p873_p12)
}
 0x222   :  { %s877_s24 = scalar_lea.hbm %s1076_s6, 1024 }
 0x223   :  { %p878_p13 = scmp.ne.s32.totalorder %s1076_s6, %s877_s24  ;;  %p881_p0 = scmp.lt.u32.totalorder %s877_s24, %s1076_s6 }
 0x225   :  { %p883_p1 = pnand %p881_p0, %p878_p13 }
 0x227   :  { %886 = shalt.err (!%p883_p1)
}
 0x228   :  { %744 = dma.vmem_to_hbm [thread:$0]  %s739_s21, 1024, %s1076_s6, [#allocation4], %s892_s7, %s892_s7, %s893_s8  }
 0x229   :  { %889 = dma.done.wait [#allocation4], 1024  }
 0x22a   :  { %890 = vsyncadd [#allocation4], 4294966272 }
 0x22b   :  { %748 = vsyncpa [#allocation3], 1 }
 0x22c   :  { %749 = vsyncpa [#allocation4], 1 }

</bundles_post_ra>
